<compile_context>
chip_gen: v7x
topology: tpu7x:2x2x1
jax: 0.10.0
libtpu: 0.0.40
codegen_flags: <defaults>
</compile_context>

<pallas_src>
import functools
import math

import jax
import jax.numpy as jnp
from jax.experimental import pallas as pl
from jax.experimental.pallas import tpu as pltpu

_TILE_BUDGET = 4 * 1024 * 1024     # per-tile byte budget (good for v6e/v7x; safe on v5e
_VMEM_LIMIT = 32 * 1024 * 1024     # because the scoped VMEM limit is set explicitly here)


# ----------------------------- kernels -------------------------------------


def _add_rows_kernel(x_ref, pe_ref, o_ref):
    # x_ref/o_ref: (TR, D_f) flattened (batch*seq) rows; pe_ref: (TR, D_f)
    # PE repeated per sequence inside the row block.  fp32 add, cast at store.
    o_ref[...] = (x_ref[...].astype(jnp.float32) + pe_ref[...]).astype(o_ref.dtype)


def _add_seq_kernel(x_ref, pe_ref, o_ref, *, seq_axis, ts):
    # x_ref/o_ref: (TS, D_f) one sequence tile of one batch element.
    # pe_ref: full (padded) PE (S_pad, D_f), resident in VMEM, sliced per tile.
    s = pl.program_id(seq_axis)
    start = pl.multiple_of(s * ts, ts)
    pe = pe_ref[pl.ds(start, ts), :]
    o_ref[...] = (x_ref[...].astype(jnp.float32) + pe).astype(o_ref.dtype)


# ----------------------------- helpers --------------------------------------


def _build_pe(seq_len, d):
    """Mirror of the PyTorch buffer construction (first `seq_len` rows), fp32."""
    pos = jnp.arange(seq_len, dtype=jnp.float32)[:, None]
    div = jnp.exp(jnp.arange(0, d, 2, dtype=jnp.float32) * (-math.log(10000.0) / d))
    pe = jnp.zeros((seq_len, d), jnp.float32)
    pe = pe.at[:, 0::2].set(jnp.sin(pos * div))
    pe = pe.at[:, 1::2].set(jnp.cos(pos * div))
    return pe


def _pick_fold(S, D):
    """Smallest rf dividing S with (rf*D) % 128 == 0 (lane-dense stores);
    fall back to rf*D >= 128, then to the full fold."""
    if D % 128 == 0:
        return 1
    divs = [r for r in range(1, S + 1) if S % r == 0]
    for r in divs:
        if (r * D) % 128 == 0:
            return r
    for r in divs:
        if r * D >= 128:
            return r
    return S


# ----------------------------- wrapper ---------------------------------------


def positional_encoding(x, max_len=64):
    """x: (B, S, D) -> x + pe[:S]  (dtype promoted against the fp32 buffer)."""
    B, S, D = x.shape
    assert S <= max_len, "sequence length exceeds max_len"
    assert D % 2 == 0, "feature dim must be even (matches the PyTorch module)"

    out_dtype = jnp.promote_types(x.dtype, jnp.float32)   # fp32 buffer promotes like torch
    in_item = jnp.dtype(x.dtype).itemsize
    out_item = jnp.dtype(out_dtype).itemsize
    eff_item = max(in_item, out_item, 4)                   # budget with the widest operand
    sub = max(8, (8 * 4) // in_item)                       # dtype-aware sublane packing

    rf = _pick_fold(S, D)
    S_f, D_f = S // rf, D * rf

    pe = _build_pe(S, D).reshape(S_f, D_f)                  # the "buffer", built once, fp32

    # TODO(synk): the (B,S,D)->(...,D_f) lane fold changes the minor dim; confirm in an
    # xprof trace (sum ALL XLA ops) that no hidden relayout copy appears around the kernel.
    x_f = x.reshape(B * S_f, D_f)

    cost = pl.CostEstimate(
        flops=B * S * D,
        bytes_accessed=B * S * D * (in_item + out_item) + S * D * 4,
        transcendentals=0,
    )

    seq_bytes = S_f * D_f * eff_item

    # ---- Layout A: flattened sublane/lane-dense rows (common case, max_len=64). ----
    tb = None
    if seq_bytes <= _TILE_BUDGET:
        tb_max = min(B, _TILE_BUDGET // seq_bytes)
        if tb_max >= B:
            tb = B                                           # one block / full rows: always legal
        else:
            gs = sub // math.gcd(S_f, sub)                   # TB multiple -> TR % sub == 0
            g8 = 8 // math.gcd(S_f, 8)                       # minimal legality: TR % 8 == 0
            if (tb_max // gs) * gs >= 1:
                tb = (tb_max // gs) * gs
            elif (tb_max // g8) * g8 >= 1:
                tb = (tb_max // g8) * g8

    if tb is not None:
        TR = tb * S_f
        n_blocks = pl.cdiv(B, tb)                            # ragged last block is masked
        pe_rows = jnp.tile(pe, (tb, 1))                      # (TR, D_f), tiny with max_len=64
        out_f = pl.pallas_call(
            _add_rows_kernel,
            out_shape=jax.ShapeDtypeStruct((B * S_f, D_f), out_dtype),
            grid_spec=pltpu.PrefetchScalarGridSpec(
                num_scalar_prefetch=0,
                grid=(n_blocks,),
                in_specs=[pl.BlockSpec((TR, D_f), lambda i: (i, 0)),
                          pl.BlockSpec((TR, D_f), lambda i: (0, 0))],
                out_specs=pl.BlockSpec((TR, D_f), lambda i: (i, 0)),
            ),
            compiler_params=pltpu.CompilerParams(
                dimension_semantics=("parallel",),
                vmem_limit_bytes=_VMEM_LIMIT),
            cost_estimate=cost,
        )(x_f, pe_rows)
        return out_f.reshape(B, S, D)

    # ---- Layout B: per-batch sequence tiles; PE resident untiled in VMEM. ----
    x3 = x_f.reshape(B, S_f, D_f)
    rows_budget = max(1, _TILE_BUDGET // (D_f * eff_item))
    if S_f <= sub:
        TS = S_f                                             # full dim -> legal block
    else:
        TS = min(S_f, max(sub, (rows_budget // sub) * sub))  # multiple of sub -> legal block
    n_s = pl.cdiv(S_f, TS)
    S_pad = n_s * TS
    pe_pad = pe if S_pad == S_f else jnp.pad(pe, ((0, S_pad - S_f), (0, 0)))

    # Order grid axes by extent so megacore sharding always has work on both cores.
    if B >= n_s:
        grid = (B, n_s)
        seq_axis = 1
        x_map = lambda b, s: (b, s, 0)
    else:
        grid = (n_s, B)
        seq_axis = 0
        x_map = lambda s, b: (b, s, 0)

    kern = functools.partial(_add_seq_kernel, seq_axis=seq_axis, ts=TS)
    x_spec = pl.BlockSpec((pl.Squeezed(), TS, D_f), x_map)
    pe_spec = pl.BlockSpec((S_pad, D_f), lambda *_: (0, 0))  # loaded once, no re-fetch

    out3 = pl.pallas_call(
        kern,
        out_shape=jax.ShapeDtypeStruct((B, S_f, D_f), out_dtype),
        grid_spec=pltpu.PrefetchScalarGridSpec(
            num_scalar_prefetch=0,
            grid=grid,
            in_specs=[x_spec, pe_spec],
            out_specs=x_spec,
        ),
        compiler_params=pltpu.CompilerParams(
            dimension_semantics=("parallel", "parallel"),
            vmem_limit_bytes=_VMEM_LIMIT),
        cost_estimate=cost,
    )(x3, pe_pad)
    return out3.reshape(B, S, D)


# ----------------------------- reference & demo ------------------------------


def _reference(x, max_len=64):
    B, S, D = x.shape
    pos = jnp.arange(max_len, dtype=jnp.float32)[:, None]
    div = jnp.exp(jnp.arange(0, D, 2, dtype=jnp.float32) * -(math.log(10000.0) / D))
    pe = jnp.zeros((max_len, D), jnp.float32)
    pe = pe.at[:, 0::2].set(jnp.sin(pos * div))
    pe = pe.at[:, 1::2].set(jnp.cos(pos * div))
    return x.astype(jnp.float32) + pe[None, :S]


if __name__ == "__main__":
    B, S, D = 2, 8, 32   # small shapes consistent with the module (max_len=64 >= S)
    key = jax.random.PRNGKey(0)
    x = jax.random.normal(key, (B, S, D), dtype=jnp.float32)

    out = jax.block_until_ready(positional_encoding(x))

    ref = _reference(x)
    assert out.shape == ref.shape and out.dtype == ref.dtype
    assert jnp.allclose(out, ref, atol=1e-5, rtol=1e-5)

    print("KERNEL_OK")
</pallas_src>

<mosaic_0001>
module attributes {stable_mosaic.version = 11 : i64} {
  func.func @_add_rows_kernel(%arg0: i32, %arg1: memref<4x128xf32, #tpu.memory_space<vmem>>, %arg2: memref<4x128xf32, #tpu.memory_space<vmem>>, %arg3: memref<4x128xf32, #tpu.memory_space<vmem>>) attributes {dimension_semantics = [#tpu.dimension_semantics<parallel>], iteration_bounds = array<i64: 1>, scalar_prefetch = 0 : i64, scratch_operands = 0 : i64, tpu.core_type = #tpu.core_type<tc>, window_params = [{transform_indices = @transform_0, window_bounds = array<i64: 4, 128>}, {pipeline_mode = #tpu.pipeline_mode<synchronous>, transform_indices = @transform_1, window_bounds = array<i64: 4, 128>}, {transform_indices = @transform_2, window_bounds = array<i64: 4, 128>}]} {
    %c0 = arith.constant 0 : index
    %c0_0 = arith.constant 0 : index
    %0 = vector.load %arg1[%c0, %c0_0] : memref<4x128xf32, #tpu.memory_space<vmem>>, vector<4x128xf32>
    %c0_1 = arith.constant 0 : index
    %c0_2 = arith.constant 0 : index
    %1 = vector.load %arg2[%c0_1, %c0_2] : memref<4x128xf32, #tpu.memory_space<vmem>>, vector<4x128xf32>
    %2 = arith.addf %0, %1 : vector<4x128xf32>
    %c0_3 = arith.constant 0 : index
    %c0_4 = arith.constant 0 : index
    %3 = vector.load %arg3[%c0_3, %c0_4] : memref<4x128xf32, #tpu.memory_space<vmem>>, vector<4x128xf32>
    tpu.vector_store %arg3[%c0_3, %c0_4], %2 {strides = array<i32>} : memref<4x128xf32, #tpu.memory_space<vmem>>, vector<4x128xf32>,
    return
  }
  func.func @transform_0(%arg0: i32) -> (i32, i32) {
    %c0_i32 = arith.constant 0 : i32
    %c0_i32_0 = arith.constant 0 : i32
    return %arg0, %c0_i32 : i32, i32
  }
  func.func @transform_1(%arg0: i32) -> (i32, i32) {
    %c0_i32 = arith.constant 0 : i32
    %c0_i32_0 = arith.constant 0 : i32
    %c0_i32_1 = arith.constant 0 : i32
    return %c0_i32, %c0_i32_0 : i32, i32
  }
  func.func @transform_2(%arg0: i32) -> (i32, i32) {
    %c0_i32 = arith.constant 0 : i32
    %c0_i32_0 = arith.constant 0 : i32
    return %arg0, %c0_i32 : i32, i32
  }
}

</mosaic_0001>

<bundles_post_ra>
// kernel: tpu_custom_call.1
= control target key start
LH: loop header
LB: loop body
LE: loop exit
PB: predicated region body
PF: predicated region fallthrough
CT: control target
= control target key end

     0   :  { %7 = vsyncpa [#allocation3], 0  ;;  %s185_s0 = inlined_call_operand.hbm [shape: f32[4,128], index: 0, kind: input, shape index: {}]   ;;  %s186_s1 = inlined_call_operand.hbm [shape: f32[4,128], index: 1, kind: input, shape index: {}]   ;;  %s187_s2 = inlined_call_operand.hbm [shape: f32[4,128], index: 2, kind: output, shape index: {}]  }
   0x1   :  { %8 = vsyncpa [#allocation6], 0 }
   0x2   :  { %9 = vsyncpa [#allocation4], 0  ;;  %s131_s9 = smov [#allocation2]   ;;  %s132_s11 = smov [#allocation5]  }
   0x3   :  { %s16_s10 = sshll.u32 %s131_s9, 4  ;;  %s26_s12 = sshll.u32 %s132_s11, 4  ;;  %s17_s10 = int_to_ptr.vmem [resolvable:$true] %s16_s10  ;;  %s27_s12 = int_to_ptr.vmem [resolvable:$true] %s26_s12 }
   0x4   :  { %s59_s15 = scalar_lea.hbm %s185_s0, 64 }
   0x5   :  { %p60_p0 = scmp.ne.s32.totalorder %s185_s0, %s59_s15  ;;  %p63_p1 = scmp.lt.u32.totalorder %s59_s15, %s185_s0 }
   0x7   :  { %p65_p2 = pnand %p63_p1, %p60_p0 }
   0x9   :  { %68 = shalt.err (!%p65_p2)
}
   0xa   :  { %s69_s20 = scalar_lea.vmem %s17_s10, 64  ;;  %p74_p4 = scmp.lt.s32.totalorder %s17_s10, %s17_s10 }
   0xb   :  { %p70_p3 = scmp.ne.s32.totalorder %s17_s10, %s69_s20  ;;  %p75_p5 = scmp.lt.s32.totalorder %s69_s20, %s69_s20 }
   0xd   :  { %p76_p6 = por %p75_p5, %p74_p4 }
   0xf   :  { %p77_p7 = pnand %p76_p6, %p70_p3 }
  0x11   :  { %80 = shalt.err (!%p77_p7)
}
  0x12   :  { %19 = dma.hbm_to_vmem [thread:$0]  %s185_s0, 64, %s17_s10, [#allocation3]  }
  0x13   :  { %s81_s25 = scalar_lea.hbm %s186_s1, 64 }
  0x14   :  { %p82_p8 = scmp.ne.s32.totalorder %s186_s1, %s81_s25  ;;  %p85_p9 = scmp.lt.u32.totalorder %s81_s25, %s186_s1 }
  0x16   :  { %p87_p10 = pnand %p85_p9, %p82_p8 }
  0x18   :  { %90 = shalt.err (!%p87_p10)
}
  0x19   :  { %s91_s30 = scalar_lea.vmem %s27_s12, 64  ;;  %p96_p12 = scmp.lt.s32.totalorder %s27_s12, %s27_s12 }
  0x1a   :  { %p92_p11 = scmp.ne.s32.totalorder %s27_s12, %s91_s30  ;;  %p97_p13 = scmp.lt.s32.totalorder %s91_s30, %s91_s30 }
  0x1c   :  { %p98_p0 = por %p97_p13, %p96_p12 }
  0x1e   :  { %p99_p1 = pnand %p98_p0, %p92_p11 }
  0x20   :  { %102 = shalt.err (!%p99_p1)
}
  0x21   :  { %29 = dma.hbm_to_vmem [thread:$0]  %s186_s1, 64, %s27_s12, [#allocation6]  }
  0x22   :  { %125 = dma.done.wait [#allocation3], 64  }
  0x23   :  { %126 = vsyncadd [#allocation3], 4294967232 }
  0x24   :  { %127 = dma.done.wait [#allocation6], 64  }
  0x25   :  { %128 = vsyncadd [#allocation6], 4294967232  ;;  %s133_s4 = smov [#allocation7]   ;;  %v36_v0 = vld [vmem:[#allocation2] sm:$0xf] }
  0x26   :  { %s46_s5 = sshll.u32 %s133_s4, 4  ;;  %v37_v1 = vld [vmem:[#allocation5] sm:$0xf]  ;;  %s47_s5 = int_to_ptr.vmem [resolvable:$true] %s46_s5 }
  0x27   :  { %v38_v2 = vadd.f32 %v37_v1, %v36_v0  ;;  %s103_s6 = scalar_lea.vmem %s47_s5, 64  ;;  %p108_p3 = scmp.lt.s32.totalorder %s47_s5, %s47_s5 }
  0x28   :  { %p104_p2 = scmp.ne.s32.totalorder %s47_s5, %s103_s6  ;;  %p109_p4 = scmp.lt.s32.totalorder %s103_s6, %s103_s6 }
  0x29   :  { %39 = vst [vmem:[#allocation7] sm:$0xf] %v38_v2 }
  0x2a   :  { %p110_p5 = por %p109_p4, %p108_p3 }
  0x2c   :  { %p111_p6 = pnand %p110_p5, %p104_p2 }
  0x2e   :  { %114 = shalt.err (!%p111_p6)
}
  0x2f   :  { %s115_s8 = scalar_lea.hbm %s187_s2, 64 }
  0x30   :  { %p116_p7 = scmp.ne.s32.totalorder %s187_s2, %s115_s8  ;;  %p119_p8 = scmp.lt.u32.totalorder %s115_s8, %s187_s2 }
  0x32   :  { %p121_p9 = pnand %p119_p8, %p116_p7 }
  0x34   :  { %124 = shalt.err (!%p121_p9)
}
  0x35   :  { %49 = dma.vmem_to_hbm [thread:$0]  %s47_s5, 64, %s187_s2, [#allocation4]  }
  0x36   :  { %129 = dma.done.wait [#allocation4], 64  }
  0x37   :  { %130 = vsyncadd [#allocation4], 4294967232 }
  0x38   :  { %53 = vsyncpa [#allocation3], 1 }
  0x39   :  { %54 = vsyncpa [#allocation6], 1 }
  0x3a   :  { %55 = vsyncpa [#allocation4], 1 }

</bundles_post_ra>
